<compile_context>
chip_gen: v7x
topology: tpu7x:2x2x1
jax: 0.10.0
libtpu: 0.0.40
codegen_flags: <defaults>
</compile_context>

<pallas_src>
import functools

import jax
import jax.numpy as jnp
from jax.experimental import pallas as pl
from jax.experimental.pallas import tpu as pltpu


def _vn_encoder_fused_kernel(x_ref, wc_ref, o_ref):
    """Fused channel-mixing matmul on one lane tile.

    x_ref : [1, C_in,  tn]  VMEM  (lane axis = flattened (3, N) points)
    wc_ref: [C_out, C_in]   VMEM  (fused W3 @ W2 @ W1)
    o_ref : [1, C_out, tn]  VMEM  (lane-dense output)
    """
    o_ref[0] = jnp.dot(
        wc_ref[...], x_ref[0],
        preferred_element_type=jnp.float32).astype(o_ref.dtype)


def vn_encoder_pallas(x, w1, w2, w3, *, tn=8192):
    """VNEncoder forward (use_relu=False).

    x  : [B, C_in, 3, N] float32
    w_i: [C_out_i, C_in_i]  (PyTorch nn.Linear weight layout, bias-free)
    """
    B, Cin, D, N = x.shape
    Cout = w3.shape[0]
    L = D * N  # flattened (3, N) point axis -> lane axis

    # use_relu=False: three bias-free channel linears collapse to one
    # [C_out, C_in] matrix.  Fused at full precision (tiny matrices).
    # TODO(synk): use_relu=True (VNLinearReLU) would need the unfused 3-matmul
    # body with the vector-neuron nonlinearity between layers; that class is
    # not part of the provided module.
    hp = jax.lax.Precision.HIGHEST
    wc = jnp.dot(w3, jnp.dot(w2, w1, precision=hp), precision=hp)  # [Cout, Cin]

    # Native-layout view: channels in sublanes, points in lanes (free reshape).
    x3 = x.reshape(B, Cin, L)

    # Lane tile: either the full (possibly ragged) lane extent, or a multiple
    # of 128 (trailing partial block is handled by Pallas).
    if L <= tn:
        tn = L
    else:
        tn = max(128, (tn // 128) * 128)
    grid = (B, pl.cdiv(L, tn))

    out3 = pl.pallas_call(
        _vn_encoder_fused_kernel,
        out_shape=jax.ShapeDtypeStruct((B, Cout, L), x.dtype),
        grid_spec=pltpu.PrefetchScalarGridSpec(
            num_scalar_prefetch=0,
            grid=grid,
            in_specs=[
                pl.BlockSpec((1, Cin, tn), lambda b, j: (b, 0, j)),
                pl.BlockSpec((Cout, Cin), lambda b, j: (0, 0)),
            ],
            out_specs=pl.BlockSpec((1, Cout, tn), lambda b, j: (b, 0, j)),
        ),
        compiler_params=pltpu.CompilerParams(
            dimension_semantics=("parallel", "parallel")),
    )(x3, wc)

    # [B, C_out, 3*N] -> [B, C_out, 3, N] (free reshape).
    return out3.reshape(B, Cout, D, N)


def _init_linear_weight(key, out_features, in_features):
    # Deterministic nn.Linear-style init: U(-1/sqrt(fan_in), 1/sqrt(fan_in)).
    bound = 1.0 / jnp.sqrt(jnp.float32(in_features))
    return jax.random.uniform(
        key, (out_features, in_features), jnp.float32, -bound, bound)


def vn_encoder_reference(x, w1, w2, w3):
    # Pure-JAX reference of the PyTorch forward (unfused 3-layer chain).
    hp = jax.lax.Precision.HIGHEST
    h = jnp.einsum("oc,bcdn->bodn", w1, x, precision=hp)
    h = jnp.einsum("oc,bcdn->bodn", w2, h, precision=hp)
    return jnp.einsum("oc,bcdn->bodn", w3, h, precision=hp)


if __name__ == "__main__":
    # Small, forward-consistent shapes: x is [B, in_channels, 3, N_samples].
    B, Cin, D, N = 2, 4, 3, 16
    Cout = 32

    key = jax.random.PRNGKey(0)
    kx, k1, k2, k3 = jax.random.split(key, 4)

    x = jax.random.normal(kx, (B, Cin, D, N), jnp.float32)
    w1 = _init_linear_weight(k1, 256, Cin)   # layer1: VNLinear(in_channels, 256)
    w2 = _init_linear_weight(k2, 128, 256)   # layer2: VNLinear(256, 128)
    w3 = _init_linear_weight(k3, Cout, 128)  # layer3: VNLinear(128, out_channels)

    run = jax.jit(functools.partial(vn_encoder_pallas, tn=8192))
    out = run(x, w1, w2, w3)
    jax.block_until_ready(out)

    ref = vn_encoder_reference(x, w1, w2, w3)
    assert out.shape == (B, Cout, D, N), out.shape
    assert jnp.allclose(out, ref, atol=1e-4, rtol=1e-4), "mismatch vs reference"

    print("KERNEL_OK")
</pallas_src>

<mosaic_0001>
module attributes {stable_mosaic.version = 11 : i64} {
  func.func @_vn_encoder_fused_kernel(%arg0: i32, %arg1: i32, %arg2: memref<1x4x48xf32, #tpu.memory_space<vmem>>, %arg3: memref<32x4xf32, #tpu.memory_space<vmem>>, %arg4: memref<1x32x48xf32, #tpu.memory_space<vmem>>) attributes {dimension_semantics = [#tpu.dimension_semantics<parallel>, #tpu.dimension_semantics<parallel>], iteration_bounds = array<i64: 2, 1>, scalar_prefetch = 0 : i64, scratch_operands = 0 : i64, tpu.core_type = #tpu.core_type<tc>, window_params = [{transform_indices = @transform_0, window_bounds = array<i64: 1, 4, 48>}, {pipeline_mode = #tpu.pipeline_mode<synchronous>, transform_indices = @transform_1, window_bounds = array<i64: 32, 4>}, {transform_indices = @transform_2, window_bounds = array<i64: 1, 32, 48>}]} {
    %c0 = arith.constant 0 : index
    %c0_0 = arith.constant 0 : index
    %0 = vector.load %arg3[%c0, %c0_0] : memref<32x4xf32, #tpu.memory_space<vmem>>, vector<32x4xf32>
    %c0_1 = arith.constant 0 : index
    %c0_2 = arith.constant 0 : index
    %c0_3 = arith.constant 0 : index
    %1 = vector.load %arg2[%c0_1, %c0_2, %c0_3] : memref<1x4x48xf32, #tpu.memory_space<vmem>>, vector<1x4x48xf32>
    %2 = vector.shape_cast %1 : vector<1x4x48xf32> to vector<4x48xf32>
    %cst = arith.constant dense<0.000000e+00> : vector<32x48xf32>
    %3 = tpu.matmul %0, %2, %cst {dimension_numbers = #tpu.dot_dimension_numbers<[1], [0], [0], [1], [0, 0, 1, 1], [], []>} : vector<32x4xf32>, vector<4x48xf32>, vector<32x48xf32> -> vector<32x48xf32>
    %c0_4 = arith.constant 0 : index
    %c0_5 = arith.constant 0 : index
    %c0_6 = arith.constant 0 : index
    %4 = vector.load %arg4[%c0_4, %c0_5, %c0_6] : memref<1x32x48xf32, #tpu.memory_space<vmem>>, vector<1x32x48xf32>
    %5 = vector.shape_cast %4 : vector<1x32x48xf32> to vector<32x48xf32>
    %6 = vector.shape_cast %3 : vector<32x48xf32> to vector<1x32x48xf32>
    tpu.vector_store %arg4[%c0_4, %c0_5, %c0_6], %6 {strides = array<i32>} : memref<1x32x48xf32, #tpu.memory_space<vmem>>, vector<1x32x48xf32>,
    return
  }
  func.func @transform_0(%arg0: i32, %arg1: i32) -> (i32, i32, i32) {
    %c0_i32 = arith.constant 0 : i32
    %c0_i32_0 = arith.constant 0 : i32
    return %arg0, %c0_i32, %arg1 : i32, i32, i32
  }
  func.func @transform_1(%arg0: i32, %arg1: i32) -> (i32, i32) {
    %c0_i32 = arith.constant 0 : i32
    %c0_i32_0 = arith.constant 0 : i32
    %c0_i32_1 = arith.constant 0 : i32
    return %c0_i32, %c0_i32_0 : i32, i32
  }
  func.func @transform_2(%arg0: i32, %arg1: i32) -> (i32, i32, i32) {
    %c0_i32 = arith.constant 0 : i32
    %c0_i32_0 = arith.constant 0 : i32
    return %arg0, %c0_i32, %arg1 : i32, i32, i32
  }
}

</mosaic_0001>

<bundles_post_ra>
// kernel: vn_encoder_pallas.1
= control target key start
LH: loop header
LB: loop body
LE: loop exit
PB: predicated region body
PF: predicated region fallthrough
CT: control target
= control target key end

     0   :  { %s458_s9 = smov 0   ;;  %s460_s10 = smov 0   ;;  %s507_s0 = inlined_call_operand.vmem [shape: f32[2,4,48], index: 0, kind: input, shape index: {}]   ;;  %s508_s1 = inlined_call_operand.vmem [shape: f32[32,4], index: 1, kind: input, shape index: {}]   ;;  %s509_s2 = inlined_call_operand.vmem [shape: f32[2,32,48], index: 2, kind: output, shape index: {}]  }
   0x1   :  { %s462_s11 = smov 0  }
   0x2 LB: > { %s24_s12 = sadd.s32 1, %s437_s10  ;;  %p368_p0 = scmp.ge.s32.totalorder %s441_s11, 1  ;;  %s441_s11 = sphi %s462_s11, %s12_s11   ;;  %s437_s10 = sphi %s460_s10, %s511_s10   ;;  %s433_s9 = sphi %s458_s9, %s510_s9  }
   0x3   : > { %p26_p1 = scmp.ge.s32.totalorder %s24_s12, 2  ;;  %p130_p2 = scmp.lt.s32.totalorder %s441_s11, 3 }
   0x5   : > { %s513_s12 = smov (%p26_p1, %s24_s12), 0  ;;  %p131_p3 = pnand %p368_p0, %p130_p2 }
   0x6   : > { %p157_p4 = scmp.lt.s32.totalorder (!%p131_p3), %s433_s9, 1  ;;  %v172_v0 = vld [vmem:[%s508_s1] sm:$0xff] (!%p131_p3)  ;;  %vm177_vm0 = vcmask (!%p131_p3), 31744   ;;  %v174_v1 = vld [vmem:[%s508_s1 + $0x10] sm:$0xff] (!%p131_p3)  ;;  %vm190_vm1 = vcmask (!%p131_p3), 1043456   ;;  %v173_v3 = vld [vmem:[%s508_s1 + $0x8] sm:$0xff] (!%p131_p3) }
   0x7   : > { %134 = sbr.rel (%p131_p3) target bundleno = 234 (0xea), region = 28  ;;  %387 = vmatprep.mubr.msk.f32.mxu0 (!%p131_p3), %vm177_vm0, %v172_v0  ;;  %390 = vmatprep.mubr.msk.f32.mxu1 (!%p131_p3), %vm177_vm0, %v174_v1  ;;  %v175_v4 = vld [vmem:[%s508_s1 + $0x18] sm:$0xff] (!%p131_p3)  ;;  %vm279_vm2 = vcmask (!%p131_p3), 392192  }
   0xe   : > { %s515_s9 = smov (!%p157_p4, %s433_s9), 1 }
   0xf   : > { %s369_s17 = sshll.u32 %s515_s9, 2  ;;  %s379_s25 = sshll.u32 %s515_s9, 5 }
  0x10   : > { %s163_s20 = scalar_lea.vmem %s507_s0, %s369_s17  ;;  %s171_s28 = scalar_lea.vmem %s509_s2, %s379_s25 }
  0x11   : > { %v176_v2 = vld [vmem:[%s163_s20] sm:$0xf] }
  0x12   : > { %385 = vmatprep.subr.msk.mxu0 %vm190_vm1, %v176_v2  ;;  %393 = vmatprep.subr.msk.mxu1 %vm190_vm1, %v176_v2 }
  0x13   : > { %386 = vmatpush3.msk.msra.mxu0 %vm190_vm1, %v176_v2  ;;  %394 = vmatpush3.msk.msra.mxu1 %vm190_vm1, %v176_v2 }
  0x14   : > { %388 = vmatmul.mubr.msk.f32.vlgmr.msra.gmra.mrb[0].mxu0 %vm177_vm0, %v173_v3  ;;  %391 = vmatmul.mubr.msk.f32.vlgmr.msra.gmra.mrb[0].mxu1 %vm177_vm0, %v175_v4 }
  0xe7   : > { %v389_v5 = vpop.f32.mrb[0].mxu0  ;;  %v392_v6 = vpop.f32.mrb[0].mxu1 }
  0xe8   : > { %281 = vst.msk [vmem:[%s171_s28 + $0x8] sm:$0xff] %vm279_vm2, %v389_v5  ;;  %283 = vst.msk [vmem:[%s171_s28 + $0x18] sm:$0xff] %vm279_vm2, %v392_v6  ;;  %v260_v7 = vpop.f32.mrb[1].mxu0  ;;  %v270_v8 = vpop.f32.mrb[1].mxu1 }
  0xe9   : > { %280 = vst.msk [vmem:[%s171_s28] sm:$0xff] %vm279_vm2, %v260_v7  ;;  %282 = vst.msk [vmem:[%s171_s28 + $0x10] sm:$0xff] %vm279_vm2, %v270_v8 }
  0xea PF: > { %s12_s11 = sadd.s32 1, %s441_s11   ;;  %s510_s9 = smov %s437_s10 }
  0xeb   : > { %p9_p5 = scmp.ge.s32.totalorder %s12_s11, 4   ;;  %s511_s10 = smov %s513_s12 }
  0xed   :  { %11 = sbr.rel (!%p9_p5) target bundleno = 2 (0x2), region = 58 }

</bundles_post_ra>
